<compile_context>
chip_gen: v7x
topology: tpu7x:2x2x1
jax: 0.10.0
libtpu: 0.0.40
codegen_flags: <defaults>
</compile_context>

<pallas_src>
import functools

import jax
import jax.numpy as jnp
from jax.experimental import pallas as pl
from jax.experimental.pallas import tpu as pltpu

KSIZE = 7
PAD = 3


def _lane_shift(x, offset, size):
    """out[..., p] = x[..., (p + offset) % size] for a static integer offset."""
    s = offset % size
    if s == 0:
        return x
    return jnp.concatenate([x[:, s:], x[:, :s]], axis=1)


def _spatial_attention_kernel(mask_ref, wcol_ref, b_ref, x_ref, o_ref, *, H, W):
    # mask_ref: VMEM (16, HW) f32 — rows 0..6 = row (dh) masks, rows 8..14 = col (dw) masks.
    # wcol_ref: VMEM (14, 7) f32 — wcol[2*kh + c, kw] = conv_w[0, c, kh, kw]
    #           (c=0 -> max-pooled map, c=1 -> avg-pooled map, matching torch.cat order).
    # b_ref:    SMEM (1,) f32 conv bias.
    # x_ref:    VMEM (1, C, HW) input block (one batch element).
    # o_ref:    VMEM (1, C, HW) output block.
    C = x_ref.shape[1]
    HW = H * W

    xin = x_ref[0]                                            # (C, HW), native dtype
    # Channel max is exact in the native dtype; channel mean accumulates in f32
    # without materializing an f32 copy of the whole tile.
    max_x = jnp.max(xin, axis=0, keepdims=True)               # (1, HW)
    sum_x = jnp.sum(xin, axis=0, keepdims=True, dtype=jnp.float32)
    avg_x = sum_x * (1.0 / C)

    # Channel order matches torch.cat((max_x, avg_x), dim=1).
    pooled = jnp.concatenate([max_x.astype(jnp.float32), avg_x], axis=0)  # (2, HW)

    masks = mask_ref[...]                                     # (16, HW), precomputed
    wcols = wcol_ref[...]                                     # (14, 7)

    # Stage 1: 7 row shifts (dh * W) of the pooled pair, row-masked -> (14, HW).
    rows = []
    for kh in range(KSIZE):
        dh = kh - PAD
        r = _lane_shift(pooled, dh * W, HW)                   # (2, HW)
        rows.append(r * masks[kh:kh + 1, :])
    stack = jnp.concatenate(rows, axis=0)                     # (14, HW)

    # Stage 2: 7 column shifts (dw) of the whole stack, col-masked, weighted per
    # sublane and accumulated; a single sublane reduction finishes the conv.
    acc = jnp.zeros((2 * KSIZE, HW), jnp.float32)
    for kw in range(KSIZE):
        dw = kw - PAD
        s = _lane_shift(stack, dw, HW)                        # (14, HW)
        cmask = masks[8 + kw:8 + kw + 1, :]                   # (1, HW)
        wcol = wcols[:, kw:kw + 1]                            # (14, 1)
        acc = acc + (s * cmask) * wcol
    conv = jnp.sum(acc, axis=0, keepdims=True) + b_ref[0]     # (1, HW)

    v = jax.nn.sigmoid(conv)                                  # (1, HW) f32
    # Lane-dense store; re-read the ref and multiply in the native dtype
    # (no f32 copy of the tile kept live across the conv phase).
    o_ref[0] = x_ref[0] * v.astype(o_ref.dtype)


def spatial_attention(x, w, b):
    """x: (B, C, H, W), w: (1, 2, 7, 7) conv weight, b: (1,) conv bias."""
    B, C, H, W = x.shape
    HW = H * W

    x_flat = x.reshape(B, C, HW)                 # contiguous collapse — free

    # Per-dw weight columns: wcol[2*kh + c, kw] = w[0, c, kh, kw].
    wcol = jnp.transpose(w[0].astype(jnp.float32), (1, 0, 2)).reshape(2 * KSIZE, KSIZE)
    b_flat = b.reshape(-1).astype(jnp.float32)   # (1,)

    # Precomputed boundary masks (hoisted out of the kernel):
    # rows 0..6 = row (dh) masks, rows 8..14 = col (dw) masks, padded to 16 sublanes.
    lane = jnp.arange(HW, dtype=jnp.int32)
    row = lane // W
    col = lane % W
    row_masks = jnp.stack(
        [((row + (kh - PAD) >= 0) & (row + (kh - PAD) < H)) for kh in range(KSIZE)])
    col_masks = jnp.stack(
        [((col + (kw - PAD) >= 0) & (col + (kw - PAD) < W)) for kw in range(KSIZE)])
    pad_row = jnp.zeros((1, HW), jnp.float32)
    masks = jnp.concatenate(
        [row_masks.astype(jnp.float32), pad_row,
         col_masks.astype(jnp.float32), pad_row], axis=0)     # (16, HW)

    # Generation-aware VMEM budget: double-buffered in/out blocks + resident
    # mask block + conv temporaries, clamped to this chip's capacity.
    itemsize = jnp.dtype(x.dtype).itemsize
    io_bytes = 4 * C * HW * itemsize             # in + out, double-buffered
    mask_bytes = 2 * 16 * HW * 4                 # constant block (conservative x2)
    tmp_bytes = (96 + C) * HW * 4                # pooled / stack / shifted / acc temps
    need = io_bytes + mask_bytes + tmp_bytes + (2 << 20)
    try:
        vmem_cap = int(pltpu.get_tpu_info().vmem_capacity_bytes)
    except Exception:
        vmem_cap = 64 * 1024 * 1024
    vmem_limit = int(min(vmem_cap - (8 << 20), max(need, 32 * 1024 * 1024)))

    kernel = functools.partial(_spatial_attention_kernel, H=H, W=W)

    out_flat = pl.pallas_call(
        kernel,
        out_shape=jax.ShapeDtypeStruct((B, C, HW), x.dtype),
        grid_spec=pltpu.PrefetchScalarGridSpec(
            num_scalar_prefetch=0,
            grid=(B,),
            in_specs=[
                pl.BlockSpec((16, HW), lambda i: (0, 0)),              # masks (constant)
                pl.BlockSpec((2 * KSIZE, KSIZE), lambda i: (0, 0)),    # weight columns
                pl.BlockSpec(memory_space=pltpu.SMEM),                 # conv bias
                pl.BlockSpec((1, C, HW), lambda i: (i, 0, 0)),         # x
            ],
            out_specs=pl.BlockSpec((1, C, HW), lambda i: (i, 0, 0)),
        ),
        compiler_params=pltpu.CompilerParams(
            dimension_semantics=("parallel",),
            vmem_limit_bytes=vmem_limit,
        ),
    )(masks, wcol, b_flat, x_flat)

    return out_flat.reshape(B, C, H, W)


def _reference(x, w, b):
    """Pure-JAX reference matching the PyTorch forward exactly."""
    B, C, H, W = x.shape
    avg_x = jnp.mean(x, axis=1, keepdims=True)
    max_x = jnp.max(x, axis=1, keepdims=True)
    inp = jnp.concatenate([max_x, avg_x], axis=1)             # (B, 2, H, W)
    padded = jnp.pad(inp, ((0, 0), (0, 0), (PAD, PAD), (PAD, PAD)))
    out = jnp.zeros((B, 1, H, W), jnp.float32) + b[0]
    for c in range(2):
        for kh in range(KSIZE):
            for kw in range(KSIZE):
                out = out + padded[:, c:c + 1, kh:kh + H, kw:kw + W] * w[0, c, kh, kw]
    return x * jax.nn.sigmoid(out)


if __name__ == "__main__":
    key = jax.random.PRNGKey(0)
    kx, kw, kb = jax.random.split(key, 3)

    B, C, H, W = 2, 4, 16, 16
    x = jax.random.normal(kx, (B, C, H, W), dtype=jnp.float32)
    # Deterministic synthetic Conv2d(2, 1, kernel_size=7) parameters.
    w = jax.random.normal(kw, (1, 2, KSIZE, KSIZE), dtype=jnp.float32) * 0.1
    b = jax.random.normal(kb, (1,), dtype=jnp.float32) * 0.1

    out = spatial_attention(x, w, b)
    out = jax.block_until_ready(out)

    ref = _reference(x, w, b)
    assert out.shape == (B, C, H, W)
    assert jnp.allclose(out, ref, atol=1e-4, rtol=1e-5), "mismatch vs reference"
    print("KERNEL_OK")
</pallas_src>

<mosaic_0001>
module attributes {stable_mosaic.version = 11 : i64} {
  func.func @_spatial_attention_kernel(%arg0: i32, %arg1: memref<16x256xf32, #tpu.memory_space<vmem>>, %arg2: memref<14x7xf32, #tpu.memory_space<vmem>>, %arg3: memref<1xf32, #tpu.memory_space<smem>>, %arg4: memref<1x4x256xf32, #tpu.memory_space<vmem>>, %arg5: memref<1x4x256xf32, #tpu.memory_space<vmem>>) attributes {dimension_semantics = [#tpu.dimension_semantics<parallel>], iteration_bounds = array<i64: 2>, scalar_prefetch = 0 : i64, scratch_operands = 0 : i64, tpu.core_type = #tpu.core_type<tc>, window_params = [{pipeline_mode = #tpu.pipeline_mode<synchronous>, transform_indices = @transform_0, window_bounds = array<i64: 16, 256>}, {pipeline_mode = #tpu.pipeline_mode<synchronous>, transform_indices = @transform_1, window_bounds = array<i64: 14, 7>}, {transform_indices = @transform_2, window_bounds = array<i64: 1>}, {transform_indices = @transform_3, window_bounds = array<i64: 1, 4, 256>}, {transform_indices = @transform_4, window_bounds = array<i64: 1, 4, 256>}]} {
    %c0 = arith.constant 0 : index
    %c0_0 = arith.constant 0 : index
    %c0_1 = arith.constant 0 : index
    %0 = vector.load %arg4[%c0, %c0_0, %c0_1] : memref<1x4x256xf32, #tpu.memory_space<vmem>>, vector<1x4x256xf32>
    %1 = vector.shape_cast %0 : vector<1x4x256xf32> to vector<4x256xf32>
    %cst = arith.constant dense<0xFF800000> : vector<256xf32>
    %2 = vector.multi_reduction <maximumf>, %1, %cst [0] : vector<4x256xf32> to vector<256xf32>
    %3 = vector.shape_cast %2 : vector<256xf32> to vector<1x256xf32>
    %cst_2 = arith.constant dense<0.000000e+00> : vector<256xf32>
    %4 = vector.multi_reduction <add>, %1, %cst_2 [0] : vector<4x256xf32> to vector<256xf32>
    %5 = vector.shape_cast %4 : vector<256xf32> to vector<1x256xf32>
    %cst_3 = arith.constant 2.500000e-01 : f32
    %6 = vector.broadcast %cst_3 : f32 to vector<1x256xf32>
    %7 = arith.mulf %5, %6 : vector<1x256xf32>
    %8 = tpu.concatenate %3, %7 in 0 : vector<1x256xf32>, vector<1x256xf32> -> vector<2x256xf32>
    %c0_4 = arith.constant 0 : index
    %c0_5 = arith.constant 0 : index
    %9 = vector.load %arg1[%c0_4, %c0_5] : memref<16x256xf32, #tpu.memory_space<vmem>>, vector<16x256xf32>
    %c0_6 = arith.constant 0 : index
    %c0_7 = arith.constant 0 : index
    %10 = vector.load %arg2[%c0_6, %c0_7] : memref<14x7xf32, #tpu.memory_space<vmem>>, vector<14x7xf32>
    %11 = vector.extract_strided_slice %8 {offsets = [0, 208], sizes = [2, 48], strides = [1, 1]} : vector<2x256xf32> to vector<2x48xf32>
    %12 = vector.extract_strided_slice %8 {offsets = [0, 0], sizes = [2, 208], strides = [1, 1]} : vector<2x256xf32> to vector<2x208xf32>
    %13 = tpu.concatenate %11, %12 in 1 : vector<2x48xf32>, vector<2x208xf32> -> vector<2x256xf32>
    %14 = vector.extract_strided_slice %9 {offsets = [0, 0], sizes = [1, 256], strides = [1, 1]} : vector<16x256xf32> to vector<1x256xf32>
    %15 = vector.broadcast %14 : vector<1x256xf32> to vector<2x256xf32>
    %16 = arith.mulf %13, %15 : vector<2x256xf32>
    %17 = vector.extract_strided_slice %8 {offsets = [0, 224], sizes = [2, 32], strides = [1, 1]} : vector<2x256xf32> to vector<2x32xf32>
    %18 = vector.extract_strided_slice %8 {offsets = [0, 0], sizes = [2, 224], strides = [1, 1]} : vector<2x256xf32> to vector<2x224xf32>
    %19 = tpu.concatenate %17, %18 in 1 : vector<2x32xf32>, vector<2x224xf32> -> vector<2x256xf32>
    %20 = vector.extract_strided_slice %9 {offsets = [1, 0], sizes = [1, 256], strides = [1, 1]} : vector<16x256xf32> to vector<1x256xf32>
    %21 = vector.broadcast %20 : vector<1x256xf32> to vector<2x256xf32>
    %22 = arith.mulf %19, %21 : vector<2x256xf32>
    %23 = vector.extract_strided_slice %8 {offsets = [0, 240], sizes = [2, 16], strides = [1, 1]} : vector<2x256xf32> to vector<2x16xf32>
    %24 = vector.extract_strided_slice %8 {offsets = [0, 0], sizes = [2, 240], strides = [1, 1]} : vector<2x256xf32> to vector<2x240xf32>
    %25 = tpu.concatenate %23, %24 in 1 : vector<2x16xf32>, vector<2x240xf32> -> vector<2x256xf32>
    %26 = vector.extract_strided_slice %9 {offsets = [2, 0], sizes = [1, 256], strides = [1, 1]} : vector<16x256xf32> to vector<1x256xf32>
    %27 = vector.broadcast %26 : vector<1x256xf32> to vector<2x256xf32>
    %28 = arith.mulf %25, %27 : vector<2x256xf32>
    %29 = vector.extract_strided_slice %9 {offsets = [3, 0], sizes = [1, 256], strides = [1, 1]} : vector<16x256xf32> to vector<1x256xf32>
    %30 = vector.broadcast %29 : vector<1x256xf32> to vector<2x256xf32>
    %31 = arith.mulf %8, %30 : vector<2x256xf32>
    %32 = vector.extract_strided_slice %8 {offsets = [0, 16], sizes = [2, 240], strides = [1, 1]} : vector<2x256xf32> to vector<2x240xf32>
    %33 = vector.extract_strided_slice %8 {offsets = [0, 0], sizes = [2, 16], strides = [1, 1]} : vector<2x256xf32> to vector<2x16xf32>
    %34 = tpu.concatenate %32, %33 in 1 : vector<2x240xf32>, vector<2x16xf32> -> vector<2x256xf32>
    %35 = vector.extract_strided_slice %9 {offsets = [4, 0], sizes = [1, 256], strides = [1, 1]} : vector<16x256xf32> to vector<1x256xf32>
    %36 = vector.broadcast %35 : vector<1x256xf32> to vector<2x256xf32>
    %37 = arith.mulf %34, %36 : vector<2x256xf32>
    %38 = vector.extract_strided_slice %8 {offsets = [0, 32], sizes = [2, 224], strides = [1, 1]} : vector<2x256xf32> to vector<2x224xf32>
    %39 = vector.extract_strided_slice %8 {offsets = [0, 0], sizes = [2, 32], strides = [1, 1]} : vector<2x256xf32> to vector<2x32xf32>
    %40 = tpu.concatenate %38, %39 in 1 : vector<2x224xf32>, vector<2x32xf32> -> vector<2x256xf32>
    %41 = vector.extract_strided_slice %9 {offsets = [5, 0], sizes = [1, 256], strides = [1, 1]} : vector<16x256xf32> to vector<1x256xf32>
    %42 = vector.broadcast %41 : vector<1x256xf32> to vector<2x256xf32>
    %43 = arith.mulf %40, %42 : vector<2x256xf32>
    %44 = vector.extract_strided_slice %8 {offsets = [0, 48], sizes = [2, 208], strides = [1, 1]} : vector<2x256xf32> to vector<2x208xf32>
    %45 = vector.extract_strided_slice %8 {offsets = [0, 0], sizes = [2, 48], strides = [1, 1]} : vector<2x256xf32> to vector<2x48xf32>
    %46 = tpu.concatenate %44, %45 in 1 : vector<2x208xf32>, vector<2x48xf32> -> vector<2x256xf32>
    %47 = vector.extract_strided_slice %9 {offsets = [6, 0], sizes = [1, 256], strides = [1, 1]} : vector<16x256xf32> to vector<1x256xf32>
    %48 = vector.broadcast %47 : vector<1x256xf32> to vector<2x256xf32>
    %49 = arith.mulf %46, %48 : vector<2x256xf32>
    %50 = tpu.concatenate %16, %22, %28, %31, %37, %43, %49 in 0 : vector<2x256xf32>, vector<2x256xf32>, vector<2x256xf32>, vector<2x256xf32>, vector<2x256xf32>, vector<2x256xf32>, vector<2x256xf32> -> vector<14x256xf32>
    %cst_8 = arith.constant 0.000000e+00 : f32
    %51 = vector.broadcast %cst_8 : f32 to vector<14x256xf32>
    %52 = vector.extract_strided_slice %50 {offsets = [0, 253], sizes = [14, 3], strides = [1, 1]} : vector<14x256xf32> to vector<14x3xf32>
    %53 = vector.extract_strided_slice %50 {offsets = [0, 0], sizes = [14, 253], strides = [1, 1]} : vector<14x256xf32> to vector<14x253xf32>
    %54 = tpu.concatenate %52, %53 in 1 : vector<14x3xf32>, vector<14x253xf32> -> vector<14x256xf32>
    %55 = vector.extract_strided_slice %9 {offsets = [8, 0], sizes = [1, 256], strides = [1, 1]} : vector<16x256xf32> to vector<1x256xf32>
    %56 = vector.extract_strided_slice %10 {offsets = [0, 0], sizes = [14, 1], strides = [1, 1]} : vector<14x7xf32> to vector<14x1xf32>
    %57 = vector.broadcast %55 : vector<1x256xf32> to vector<14x256xf32>
    %58 = arith.mulf %54, %57 : vector<14x256xf32>
    %59 = vector.broadcast %56 : vector<14x1xf32> to vector<14x256xf32>
    %60 = arith.mulf %58, %59 : vector<14x256xf32>
    %61 = arith.addf %51, %60 : vector<14x256xf32>
    %62 = vector.extract_strided_slice %50 {offsets = [0, 254], sizes = [14, 2], strides = [1, 1]} : vector<14x256xf32> to vector<14x2xf32>
    %63 = vector.extract_strided_slice %50 {offsets = [0, 0], sizes = [14, 254], strides = [1, 1]} : vector<14x256xf32> to vector<14x254xf32>
    %64 = tpu.concatenate %62, %63 in 1 : vector<14x2xf32>, vector<14x254xf32> -> vector<14x256xf32>
    %65 = vector.extract_strided_slice %9 {offsets = [9, 0], sizes = [1, 256], strides = [1, 1]} : vector<16x256xf32> to vector<1x256xf32>
    %66 = vector.extract_strided_slice %10 {offsets = [0, 1], sizes = [14, 1], strides = [1, 1]} : vector<14x7xf32> to vector<14x1xf32>
    %67 = vector.broadcast %65 : vector<1x256xf32> to vector<14x256xf32>
    %68 = arith.mulf %64, %67 : vector<14x256xf32>
    %69 = vector.broadcast %66 : vector<14x1xf32> to vector<14x256xf32>
    %70 = arith.mulf %68, %69 : vector<14x256xf32>
    %71 = arith.addf %61, %70 : vector<14x256xf32>
    %72 = vector.extract_strided_slice %50 {offsets = [0, 255], sizes = [14, 1], strides = [1, 1]} : vector<14x256xf32> to vector<14x1xf32>
    %73 = vector.extract_strided_slice %50 {offsets = [0, 0], sizes = [14, 255], strides = [1, 1]} : vector<14x256xf32> to vector<14x255xf32>
    %74 = tpu.concatenate %72, %73 in 1 : vector<14x1xf32>, vector<14x255xf32> -> vector<14x256xf32>
    %75 = vector.extract_strided_slice %9 {offsets = [10, 0], sizes = [1, 256], strides = [1, 1]} : vector<16x256xf32> to vector<1x256xf32>
    %76 = vector.extract_strided_slice %10 {offsets = [0, 2], sizes = [14, 1], strides = [1, 1]} : vector<14x7xf32> to vector<14x1xf32>
    %77 = vector.broadcast %75 : vector<1x256xf32> to vector<14x256xf32>
    %78 = arith.mulf %74, %77 : vector<14x256xf32>
    %79 = vector.broadcast %76 : vector<14x1xf32> to vector<14x256xf32>
    %80 = arith.mulf %78, %79 : vector<14x256xf32>
    %81 = arith.addf %71, %80 : vector<14x256xf32>
    %82 = vector.extract_strided_slice %9 {offsets = [11, 0], sizes = [1, 256], strides = [1, 1]} : vector<16x256xf32> to vector<1x256xf32>
    %83 = vector.extract_strided_slice %10 {offsets = [0, 3], sizes = [14, 1], strides = [1, 1]} : vector<14x7xf32> to vector<14x1xf32>
    %84 = vector.broadcast %82 : vector<1x256xf32> to vector<14x256xf32>
    %85 = arith.mulf %50, %84 : vector<14x256xf32>
    %86 = vector.broadcast %83 : vector<14x1xf32> to vector<14x256xf32>
    %87 = arith.mulf %85, %86 : vector<14x256xf32>
    %88 = arith.addf %81, %87 : vector<14x256xf32>
    %89 = vector.extract_strided_slice %50 {offsets = [0, 1], sizes = [14, 255], strides = [1, 1]} : vector<14x256xf32> to vector<14x255xf32>
    %90 = vector.extract_strided_slice %50 {offsets = [0, 0], sizes = [14, 1], strides = [1, 1]} : vector<14x256xf32> to vector<14x1xf32>
    %91 = tpu.concatenate %89, %90 in 1 : vector<14x255xf32>, vector<14x1xf32> -> vector<14x256xf32>
    %92 = vector.extract_strided_slice %9 {offsets = [12, 0], sizes = [1, 256], strides = [1, 1]} : vector<16x256xf32> to vector<1x256xf32>
    %93 = vector.extract_strided_slice %10 {offsets = [0, 4], sizes = [14, 1], strides = [1, 1]} : vector<14x7xf32> to vector<14x1xf32>
    %94 = vector.broadcast %92 : vector<1x256xf32> to vector<14x256xf32>
    %95 = arith.mulf %91, %94 : vector<14x256xf32>
    %96 = vector.broadcast %93 : vector<14x1xf32> to vector<14x256xf32>
    %97 = arith.mulf %95, %96 : vector<14x256xf32>
    %98 = arith.addf %88, %97 : vector<14x256xf32>
    %99 = vector.extract_strided_slice %50 {offsets = [0, 2], sizes = [14, 254], strides = [1, 1]} : vector<14x256xf32> to vector<14x254xf32>
    %100 = vector.extract_strided_slice %50 {offsets = [0, 0], sizes = [14, 2], strides = [1, 1]} : vector<14x256xf32> to vector<14x2xf32>
    %101 = tpu.concatenate %99, %100 in 1 : vector<14x254xf32>, vector<14x2xf32> -> vector<14x256xf32>
    %102 = vector.extract_strided_slice %9 {offsets = [13, 0], sizes = [1, 256], strides = [1, 1]} : vector<16x256xf32> to vector<1x256xf32>
    %103 = vector.extract_strided_slice %10 {offsets = [0, 5], sizes = [14, 1], strides = [1, 1]} : vector<14x7xf32> to vector<14x1xf32>
    %104 = vector.broadcast %102 : vector<1x256xf32> to vector<14x256xf32>
    %105 = arith.mulf %101, %104 : vector<14x256xf32>
    %106 = vector.broadcast %103 : vector<14x1xf32> to vector<14x256xf32>
    %107 = arith.mulf %105, %106 : vector<14x256xf32>
    %108 = arith.addf %98, %107 : vector<14x256xf32>
    %109 = vector.extract_strided_slice %50 {offsets = [0, 3], sizes = [14, 253], strides = [1, 1]} : vector<14x256xf32> to vector<14x253xf32>
    %110 = vector.extract_strided_slice %50 {offsets = [0, 0], sizes = [14, 3], strides = [1, 1]} : vector<14x256xf32> to vector<14x3xf32>
    %111 = tpu.concatenate %109, %110 in 1 : vector<14x253xf32>, vector<14x3xf32> -> vector<14x256xf32>
    %112 = vector.extract_strided_slice %9 {offsets = [14, 0], sizes = [1, 256], strides = [1, 1]} : vector<16x256xf32> to vector<1x256xf32>
    %113 = vector.extract_strided_slice %10 {offsets = [0, 6], sizes = [14, 1], strides = [1, 1]} : vector<14x7xf32> to vector<14x1xf32>
    %114 = vector.broadcast %112 : vector<1x256xf32> to vector<14x256xf32>
    %115 = arith.mulf %111, %114 : vector<14x256xf32>
    %116 = vector.broadcast %113 : vector<14x1xf32> to vector<14x256xf32>
    %117 = arith.mulf %115, %116 : vector<14x256xf32>
    %118 = arith.addf %108, %117 : vector<14x256xf32>
    %cst_9 = arith.constant dense<0.000000e+00> : vector<256xf32>
    %119 = vector.multi_reduction <add>, %118, %cst_9 [0] : vector<14x256xf32> to vector<256xf32>
    %120 = vector.shape_cast %119 : vector<256xf32> to vector<1x256xf32>
    %c0_10 = arith.constant 0 : index
    %121 = memref.load %arg3[%c0_10] : memref<1xf32, #tpu.memory_space<smem>>
    %122 = vector.broadcast %121 : f32 to vector<1x256xf32>
    %123 = arith.addf %120, %122 : vector<1x256xf32>
    %124 = arith.negf %123 : vector<1x256xf32>
    %125 = math.exp %124 : vector<1x256xf32>
    %cst_11 = arith.constant 1.000000e+00 : f32
    %126 = vector.broadcast %cst_11 : f32 to vector<1x256xf32>
    %127 = arith.addf %126, %125 : vector<1x256xf32>
    %128 = arith.divf %126, %127 : vector<1x256xf32>
    %c0_12 = arith.constant 0 : index
    %c0_13 = arith.constant 0 : index
    %c0_14 = arith.constant 0 : index
    %129 = vector.load %arg4[%c0_12, %c0_13, %c0_14] : memref<1x4x256xf32, #tpu.memory_space<vmem>>, vector<1x4x256xf32>
    %130 = vector.shape_cast %129 : vector<1x4x256xf32> to vector<4x256xf32>
    %131 = vector.broadcast %128 : vector<1x256xf32> to vector<4x256xf32>
    %132 = arith.mulf %130, %131 : vector<4x256xf32>
    %c0_15 = arith.constant 0 : index
    %c0_16 = arith.constant 0 : index
    %c0_17 = arith.constant 0 : index
    %133 = vector.load %arg5[%c0_15, %c0_16, %c0_17] : memref<1x4x256xf32, #tpu.memory_space<vmem>>, vector<1x4x256xf32>
    %134 = vector.shape_cast %133 : vector<1x4x256xf32> to vector<4x256xf32>
    %135 = vector.shape_cast %132 : vector<4x256xf32> to vector<1x4x256xf32>
    tpu.vector_store %arg5[%c0_15, %c0_16, %c0_17], %135 {strides = array<i32>} : memref<1x4x256xf32, #tpu.memory_space<vmem>>, vector<1x4x256xf32>,
    return
  }
  func.func @transform_0(%arg0: i32) -> (i32, i32) {
    %c0_i32 = arith.constant 0 : i32
    %c0_i32_0 = arith.constant 0 : i32
    %c0_i32_1 = arith.constant 0 : i32
    return %c0_i32, %c0_i32_0 : i32, i32
  }
  func.func @transform_1(%arg0: i32) -> (i32, i32) {
    %c0_i32 = arith.constant 0 : i32
    %c0_i32_0 = arith.constant 0 : i32
    %c0_i32_1 = arith.constant 0 : i32
    return %c0_i32, %c0_i32_0 : i32, i32
  }
  func.func @transform_2(%arg0: i32) -> i32 {
    %c0_i32 = arith.constant 0 : i32
    %c0_i32_0 = arith.constant 0 : i32
    return %c0_i32 : i32
  }
  func.func @transform_3(%arg0: i32) -> (i32, i32, i32) {
    %c0_i32 = arith.constant 0 : i32
    %c0_i32_0 = arith.constant 0 : i32
    %c0_i32_1 = arith.constant 0 : i32
    return %arg0, %c0_i32, %c0_i32_0 : i32, i32, i32
  }
  func.func @transform_4(%arg0: i32) -> (i32, i32, i32) {
    %c0_i32 = arith.constant 0 : i32
    %c0_i32_0 = arith.constant 0 : i32
    %c0_i32_1 = arith.constant 0 : i32
    return %arg0, %c0_i32, %c0_i32_0 : i32, i32, i32
  }
}

</mosaic_0001>

<bundles_post_ra>
// kernel: tpu_custom_call.1
= control target key start
LH: loop header
LB: loop body
LE: loop exit
PB: predicated region body
PF: predicated region fallthrough
CT: control target
= control target key end

     0   :  { %s1543_s0 = inlined_call_operand.hbm [shape: f32[16,256], index: 0, kind: input, shape index: {}]   ;;  %s1544_s1 = inlined_call_operand.vmem [shape: f32[14,7], index: 1, kind: input, shape index: {}]   ;;  %s1545_s2 = inlined_call_operand.<no memory space> [shape: f32[1], index: 2, kind: input, shape index: {}]   ;;  %s1546_s3 = inlined_call_operand.vmem [shape: f32[2,4,256], index: 3, kind: input, shape index: {}]   ;;  %s1547_s4 = inlined_call_operand.hbm [shape: f32[2,4,256], index: 4, kind: output, shape index: {}]  }
   0x1   :  { %9 = sst [smem:[#allocation2]] %s1545_s2 }
   0x2   :  { %10 = vsyncpa [#allocation4], 0 }
   0x3   :  { %11 = vsyncpa [#allocation5], 0 }
   0x4   :  { %13 = vsyncpa [#allocation5 + $0x1], 0  ;;  %s1125_s17 = smov 0   ;;  %s1127_s18 = smov 0  }
   0x5   :  { %s1129_s19 = smov 0   ;;  %s1131_s20 = smov 0  }
   0x6 LB: > { %s1146_s2 = sadd.s32 4294967295, %s1072_s20   ;;  %s870_s21 = sadd.s32 4294967294, %s1072_s20   ;;  %s1072_s20 = sphi %s1131_s20, %s1563_s20   ;;  %s1068_s19 = sphi %s1129_s19, %s1562_s19   ;;  %s1064_s18 = sphi %s1127_s18, %s1561_s18   ;;  %s1060_s17 = sphi %s1125_s17, %s1560_s17  }
   0x7   : > { %s1150_s22 = sadd.s32 1, %s1072_s20   ;;  %s115_s23 = sadd.s32 1, %s1068_s19 }
   0x8   : > { %s112_s24 = ssub.s32 %s1072_s20, %s1150_s22  ;;  %p125_p0 = scmp.ne.s32.totalorder %s1068_s19, %s1064_s18 }
   0x9   : > { %p113_p1 = scmp.eq.s32.totalorder %s112_s24, 0  ;;  %p126_p2 = scmp.eq.s32.totalorder %s1146_s2, 1 }
   0xa   : > { %p131_p3 = scmp.ne.s32.totalorder %s1064_s18, %s1060_s17  ;;  %p132_p4 = scmp.eq.s32.totalorder %s870_s21, 1 }
   0xb   : > { %s1161_s25 = scalar_select %p113_p1, %s1068_s19, %s115_s23  }
   0xc   : > { %p1163_p5 = por %p126_p2, %p125_p0  ;;  %p1167_p6 = por %p132_p4, %p131_p3 }
   0xd   : > { %p871_p7 = scmp.ge.s32.totalorder %s1072_s20, 1  ;;  %p139_p8 = scmp.lt.s32.totalorder %s1072_s20, 3 }
   0xe   : > { %s1551_s26 = scalar_select %p1163_p5, 1, 0 }
   0xf   : > { %s1552_s27 = scalar_select %p1167_p6, 1, 0 }
  0x10   : > { %p1548_p9 = scmp.eq.s32.totalorder %s1146_s2, 0  ;;  %p1174_p10 = pnand %p871_p7, %p139_p8 }
  0x11   : > { %s1074_s29 = smov [#allocation3]   ;;  %s978_s8 = scalar_lea.hbm %s1543_s0, 512 }
  0x12   : > { %s1553_s28 = scalar_select %p1174_p10, 1, 0 }
  0x13   : > { %s151_s30 = sshll.u32 %s1074_s29, 4  ;;  %p894_p11 = pneg %p1174_p10  ;;  %s152_s30 = int_to_ptr.vmem [resolvable:$true] %s151_s30 }
  0x14   : > { %p979_p13 = scmp.ne.s32.totalorder %s1543_s0, %s978_s8  ;;  %p985_p3 = scmp.lt.u32.totalorder %s978_s8, %s1543_s0 }
  0x15   : > { %p1182_p12 = pnand %p1548_p9, %p894_p11 }
  0x17   : > { %p980_p0 = pneg %p1182_p12 }
  0x19   : > { %p981_p1 = pnand %p980_p0, %p979_p13 }
  0x1b   : > { %p982_p2 = pneg %p981_p1 }
  0x1d   : > { %p987_p4 = pnand %p985_p3, %p982_p2 }
  0x1f   : > { %990 = shalt.err (!%p987_p4)
}
  0x20   : > { %s991_s13 = scalar_lea.vmem %s152_s30, 512  ;;  %p999_p9 = scmp.lt.s32.totalorder %s152_s30, %s152_s30 }
  0x21   : > { %p992_p7 = scmp.ne.s32.totalorder %s152_s30, %s991_s13  ;;  %p1000_p6 = scmp.lt.s32.totalorder %s991_s13, %s991_s13 }
  0x23   : > { %p994_p8 = pnand %p992_p7, %p980_p0  ;;  %p1001_p5 = por %p1000_p6, %p999_p9 }
  0x25   : > { %p995_p11 = pneg %p994_p8 }
  0x27   : > { %p1002_p10 = pnand %p1001_p5, %p995_p11 }
  0x29   : > { %1005 = shalt.err (!%p1002_p10)
}
  0x2a   : > { %s1075_s14 = smov 256   ;;  %s1076_s15 = smov 16  }
  0x2b   : > { %897 = dma.hbm_to_vmem [thread:$0]  (!%p1182_p12), %s1543_s0, 512, %s152_s30, [#allocation4], %s1075_s14, %s1075_s14, %s1076_s15  }
  0x2c   : > { %p1555_p13 = scmp.ne.s32.totalorder %s1553_s28, 0 }
  0x2d   : > { %p1556_p1 = scmp.eq.s32.totalorder (!%p1555_p13), %s1146_s2, 0 }
  0x2e   : > { %181 = sbr.rel (%p1555_p13) target bundleno = 469 (0x1d5), region = 36 }
  0x35   : > { %1051 = dma.done.wait (%p1556_p1), [#allocation4], 512   ;;  %p1557_p0 = pmov %p1556_p1 }
  0x36   : > { %p207_p5 = scmp.lt.s32.totalorder %s1146_s2, 1  ;;  %v1077_v0 = vmov 1   ;;  %v1078_v1 = vmov 0   ;;  %vm216_vm0 = vcmask 1043456   ;;  %vm247_vm1 = vcmask 1040384   ;;  %s1079_s5 = smov 96  }
  0x37   : > { %1053 = vsyncadd (%p1557_p0), [#allocation4], 4294966784  ;;  %960 = vset.pattern.permute.xlu1 %v1077_v0  ;;  %959 = vset.pattern.permute.xlu0 %v1078_v1  ;;  %s1080_s6 = smov 32   ;;  %s1081_s7 = smov 16   ;;  %v255_v36 = vld [vmem:[%s1544_s1 + $0x8] sm:$0x3f]  ;;  %v268_v44 = vlaneseq }
  0x38   : > { %s208_s23 = scalar_select %p207_p5, %s1146_s2, 1  ;;  %v254_v37 = vld [vmem:[%s1544_s1] sm:$0xff]  ;;  %v1085_v38 = vmov 2   ;;  %v1086_v39 = vmov 3   ;;  %v1087_v40 = vmov 4   ;;  %v1088_v41 = vmov 5  }
  0x39   : > { %s1082_s8 = smov 80   ;;  %s1083_s9 = smov 48   ;;  %v1089_v42 = vmov 6   ;;  %v269_v47 = vshrl.u32 %v268_v44, 7  ;;  %vm283_vm2 = vcmask 261120   ;;  %v1251_v52 = vld [vmem:[#allocation3 + $0x8] sm:$0xff] }
  0x3a   : > { %s886_s24 = sshll.u32 %s208_s23, 3  ;;  %s1084_s10 = smov 112   ;;  %vm303_vm3 = vcmask 130048   ;;  %vm263_vm4 = vcmask 392192   ;;  %vm418_vm5 = vcmask 1041408   ;;  %vm423_vm6 = vcmask 1045504  }
  0x3b   : > { %s211_s28 = scalar_lea.vmem %s1546_s3, %s886_s24  ;;  %v1245_v49 = vsub.s32 1, %v269_v47  ;;  %v1247_v50 = vsub.s32 3, %v269_v47  ;;  %v1253_v53 = vsub.s32 2, %v269_v47  ;;  %v1262_v57 = vsub.s32 0, %v269_v47  ;;  %s1090_s15 = smov 3  }
  0x3c   : > { %v1214_v2 = vld [vmem:[%s211_s28] sm:$0xff]  ;;  %vm352_vm7 = vcmask 785408   ;;  %vm372_vm8 = vcmask 654336   ;;  %vm332_vm9 = vcmask 916480   ;;  %s1091_s16 = smov 2   ;;  %s1092_s21 = smov 1  }
  0x3d   : > { %v217_v3 = vsel %vm216_vm0, %v1214_v2, -inf  ;;  %v231_v4 = vsel %vm216_vm0, %v1214_v2, 0.0  ;;  %v214_v5 = vcombine.high %v1214_v2, %v1214_v2  ;;  %v295_v54 = vrot.slane %v1251_v52, %v1245_v49  ;;  %s1093_s23 = smov 127   ;;  %s1094_s24 = smov 126  }
  0x3e   : > { %v218_v6 = vrot.slane %v217_v3, 4  ;;  %v232_v7 = vrot.slane %v231_v4, 4  ;;  %v325_v58 = vrot.slane %v1251_v52, %v1247_v50  ;;  %v315_v59 = vrot.slane %v1251_v52, %v1253_v53  ;;  %s1095_s29 = smov 125   ;;  %s762_s30 = sld [smem:[#allocation2]] }
  0x3f   : > { %v224_v8 = vsel %vm216_vm0, %v214_v5, -inf  ;;  %v238_v9 = vsel %vm216_vm0, %v214_v5, 0.0  ;;  %vm444_vm10 = vcmask 23552   ;;  %vm493_vm11 = vcmask 15360   ;;  %s204_s28 = sand.u32 1, %s1064_s18   ;;  %p1558_p9 = scmp.ne.s32.totalorder %s1551_s26, 0 }
  0x40   : > { %v219_v10 = vmax.f32 %v217_v3, %v218_v6  ;;  %v233_v11 = vadd.f32 %v232_v7, %v231_v4  ;;  %v225_v12 = vrot.slane %v224_v8, 4  ;;  %v239_v13 = vrot.slane %v238_v9, 4  ;;  %v1279_v6 = vld [vmem:[#allocation3 + $0x18] sm:$0xff]  ;;  %s785_s12 = scalar_lea.sflag [#allocation5], %s204_s28 }
  0x41   : > { %vm540_vm12 = vcmask 7168   ;;  %vm613_vm13 = vcmask 1039360   ;;  %vm660_vm14 = vcmask 1031168   ;;  %vm707_vm15 = vcmask 1022976  }
  0x42   : > { %v220_v14 = vrot.slane %v219_v10, 2  ;;  %v234_v15 = vrot.slane %v233_v11, 2  ;;  %v226_v16 = vmax.f32 %v224_v8, %v225_v12  ;;  %v240_v17 = vadd.f32 %v239_v13, %v238_v9 }
  0x43   : > { %v584_v12 = vrot.slane %v1279_v6, %v1247_v50 }
  0x44   : > { %v221_v18 = vmax.f32 %v219_v10, %v220_v14  ;;  %v235_v19 = vadd.f32 %v234_v15, %v233_v11  ;;  %v241_v20 = vrot.slane %v240_v17, 2  ;;  %v227_v23 = vrot.slane %v226_v16, 2 }
  0x46   : > { %v222_v21 = vrot.slane %v221_v18, 1  ;;  %v236_v22 = vrot.slane %v235_v19, 1  ;;  %v242_v24 = vadd.f32 %v241_v20, %v240_v17  ;;  %v228_v28 = vmax.f32 %v226_v16, %v227_v23 }
  0x47   : > { %v1291_v16 = vsub.s32 5, %v269_v47  ;;  %v1304_v23 = vsub.s32 4, %v269_v47 }
  0x48   : > { %v223_v25 = vmax.f32 %v221_v18, %v222_v21  ;;  %v237_v26 = vadd.f32 %v236_v22, %v235_v19  ;;  %v243_v29 = vrot.slane %v242_v24, 1  ;;  %v229_v31 = vrot.slane %v228_v28, 1  ;;  %v1296_v18 = vld [vmem:[#allocation3] sm:$0xff] }
  0x49   : > { %v1298_v19 = vsub.s32 6, %v269_v47  ;;  %v361_v21 = vrot.slane %v1296_v18, %v1291_v16  ;;  %v365_v22 = vrot.slane %v1251_v52, %v1291_v16 }
  0x4a   : > { %v245_v27 = vmul.f32 0.25, %v237_v26  ;;  %v244_v32 = vadd.f32 %v243_v29, %v242_v24  ;;  %v230_v33 = vmax.f32 %v228_v28, %v229_v31 }
  0x4b   : > { %v381_v26 = vrot.slane %v1296_v18, %v1298_v19 }
  0x4c   : > { %v1225_v30 = vsel %vm247_vm1, %v223_v25, %v245_v27  ;;  %v246_v34 = vmul.f32 0.25, %v244_v32  ;;  %v385_v27 = vrot.slane %v1251_v52, %v1298_v19 }
  0x4d   : > { %348 = vrot.lane.b32.xlu1 %v1225_v30, %s1079_s5  ;;  %281 = vrot.lane.b32.xlu0 %v1225_v30, %s1080_s6 }
  0x4e   : > { %v249_v35 = vsel %vm247_vm1, %v230_v33, %v246_v34  ;;  %v341_v34 = vrot.slane %v1296_v18, %v1304_v23 }
  0x51   : > { %301 = vrot.lane.b32.xlu1 %v1225_v30, %s1081_s7  ;;  %368 = vrot.lane.b32.xlu0 %v1225_v30, %s1082_s8 }
  0x55   : > { %261 = vrot.lane.b32.xlu1 %v1225_v30, %s1083_s9  ;;  %328 = vrot.lane.b32.xlu0 %v1225_v30, %s1084_s10 }
  0x59   : > { %350 = vrot.lane.b32.xlu1 %v249_v35, %s1079_s5  ;;  %278 = vrot.lane.b32.xlu0 %v249_v35, %s1080_s6  ;;  %s876_s5 = sshll.u32 %s204_s28, 3  ;;  %s887_s6 = sshll.u32 %s1146_s2, 7 }
  0x5a   : > { %s1501_s11 = scalar_lea.hbm %s1547_s4, %s887_s6  ;;  %s1096_s2 = smov [#allocation6]  }
  0x5b   : > { %s1010_s14 = sshll.u32 %s1096_s2, 4  ;;  %s1011_s14 = int_to_ptr.vmem [resolvable:$false] %s1010_s14 }
  0x5d   : > { %370 = vrot.lane.b32.xlu1 %v249_v35, %s1082_s8  ;;  %298 = vrot.lane.b32.xlu0 %v249_v35, %s1081_s7  ;;  %s206_s7 = scalar_lea.vmem [#allocation6], %s876_s5 }
  0x5e   : > { %s799_s8 = sshll.u32 %s206_s7, 4  ;;  %s1503_s8 = int_to_ptr.vmem [resolvable:$true] %s799_s8 }
  0x5f   : > { %s1006_s13 = scalar_lea.vmem %s1503_s8, 128  ;;  %p1013_p2 = scmp.lt.s32.totalorder %s1503_s8, %s1011_s14 }
  0x60   : > { %p1007_p6 = scmp.ne.s32.totalorder %s1503_s8, %s1006_s13 }
  0x61   : > { %519 = vperm.xlu1 %960, %v255_v36   ;;  %257 = vrot.lane.b32.xlu0 %v249_v35, %s1083_s9 }
  0x62   : > { %p1008_p10 = pnand %p1007_p6, %p1558_p9 }
  0x64   : > { %p1009_p12 = pneg %p1008_p10 }
  0x65   : > { %472 = vperm.xlu0 %959, %v255_v36   ;;  %330 = vrot.lane.b32.xlu1 %v249_v35, %s1084_s10 }
  0x66   : > { %961 = vset.pattern.permute.xlu1 %v1078_v1  ;;  %v327_v1 = vmul.f32 %v325_v58, %v249_v35  ;;  %v345_v35 = vrot.slane %v1251_v52, %v1304_v23 }
  0x68   : > { %v403_v9 = vrot.slane %v327_v1, 2 }
  0x69   : > { %962 = vset.pattern.permute.xlu0 %v1077_v0  ;;  %467 = vperm.xlu1 %961, %v254_v37   ;;  %v275_v0 = vrot.slane %v1251_v52, %v1262_v57 }
  0x6a   : > { %515 = vperm.xlu0 %962, %v254_v37  }
  0x6d   : > { %963 = vset.pattern.permute.xlu1 %v1085_v38 }
  0x6e   : > { %964 = vset.pattern.permute.xlu0 %v1086_v39  ;;  %566 = vperm.xlu1 %963, %v255_v36  }
  0x6f   : > { %594 = vperm.xlu0 %964, %v255_v36  }
  0x72   : > { %562 = vperm.xlu1 %963, %v254_v37  }
  0x73   : > { %590 = vperm.xlu0 %964, %v254_v37  }
  0x76   : > { %965 = vset.pattern.permute.xlu1 %v1087_v40 }
  0x77   : > { %641 = vperm.xlu1 %965, %v255_v36   ;;  %966 = vset.pattern.permute.xlu0 %v1087_v40 }
  0x78   : > { %637 = vperm.xlu0 %966, %v254_v37  }
  0x7b   : > { %967 = vset.pattern.permute.xlu1 %v1088_v41  ;;  %v1318_v41 = vld [vmem:[#allocation3 + $0x10] sm:$0xff] }
  0x7c   : > { %688 = vperm.xlu1 %967, %v255_v36   ;;  %968 = vset.pattern.permute.xlu0 %v1089_v42  ;;  %v1324_v52 = vrot.slane %v1318_v41, %v1247_v50 }
  0x7d   : > { %735 = vperm.xlu0 %968, %v255_v36  }
  0x80   : > { %684 = vperm.xlu1 %967, %v254_v37  }
  0x81   : > { %731 = vperm.xlu0 %968, %v254_v37  }
  0xbf   : > { %v1241_v43 = vpop.permute.xlu0 %281  ;;  %v349_v46 = vpop.permute.xlu1 %348 }
  0xc3   : > { %v369_v45 = vpop.permute.xlu0 %368  ;;  %v1249_v51 = vpop.permute.xlu1 %301 }
  0xc7   : > { %v1243_v48 = vpop.permute.xlu0 %328  ;;  %v1270_v62 = vpop.permute.xlu1 %261 }
  0xcb   : > { %v1257_v55 = vpop.permute.xlu0 %278  ;;  %v351_v10 = vpop.permute.xlu1 %350 }
  0xcc   : > { %v284_v56 = vsel %vm283_vm2, %v1241_v43, %v1257_v55  ;;  %v353_v24 = vsel %vm352_vm7, %v349_v46, %v351_v10  ;;  %v357_v25 = vsel %vm352_vm7, %v351_v10, %v349_v46  ;;  %v287_v1 = vsel %vm283_vm2, %v1257_v55, %v1241_v43 }
  0xcd   : > { %v297_v60 = vmul.f32 %v295_v54, %v284_v56  ;;  %v366_v32 = vmul.f32 %v361_v21, %v353_v24  ;;  %v367_v33 = vmul.f32 %v365_v22, %v357_v25  ;;  %v321_v55 = vrot.slane %v1296_v18, %v1247_v50 }
  0xcf   : > { %v1268_v61 = vpop.permute.xlu0 %298  ;;  %v391_v4 = vrot.slane %v297_v60, 6  ;;  %v371_v20 = vpop.permute.xlu1 %370  ;;  %v408_v42 = vrot.slane %v366_v32, 6  ;;  %v409_v44 = vrot.slane %v367_v33, 6  ;;  %v1406_v33 = vrot.slane %v1318_v41, %v1262_v57 }
  0xd0   : > { %v304_v63 = vsel %vm303_vm3, %v1249_v51, %v1268_v61  ;;  %v373_v28 = vsel %vm372_vm8, %v369_v45, %v371_v20  ;;  %v377_v29 = vsel %vm372_vm8, %v371_v20, %v369_v45  ;;  %v307_v43 = vsel %vm303_vm3, %v1268_v61, %v1249_v51 }
  0xd1   : > { %v317_v3 = vmul.f32 %v315_v59, %v304_v63  ;;  %v386_v36 = vmul.f32 %v381_v26, %v373_v28  ;;  %v387_v37 = vmul.f32 %v385_v27, %v377_v29 }
  0xd3   : > { %v1277_v5 = vpop.permute.xlu0 %257  ;;  %v397_v11 = vrot.slane %v317_v3, 4  ;;  %v414_v47 = vrot.slane %v386_v36, 4  ;;  %v415_v54 = vrot.slane %v387_v37, 4  ;;  %v509_v36 = vrot.slane %v1279_v6, %v1245_v49 }
  0xd4   : > { %v264_v7 = vsel %vm263_vm4, %v1270_v62, %v1277_v5 }
  0xd5   : > { %v277_v8 = vmul.f32 %v275_v0, %v264_v7  ;;  %v291_v0 = vrot.slane %v1296_v18, %v1245_v49  ;;  %v311_v7 = vrot.slane %v1296_v18, %v1253_v53 }
  0xd7   : > { %v420_v13 = vsel %vm418_vm5, %v277_v8, %v391_v4  ;;  %v296_v3 = vmul.f32 %v291_v0, %v287_v1  ;;  %v271_v4 = vrot.slane %v1296_v18, %v1262_v57  ;;  %v267_v8 = vsel %vm263_vm4, %v1277_v5, %v1270_v62 }
  0xd8   : > { %v422_v14 = vsel %vm216_vm0, %v420_v13, %v397_v11  ;;  %v316_v11 = vmul.f32 %v311_v7, %v307_v43 }
  0xd9   : > { %v1289_v15 = vsel %vm423_vm6, %v422_v14, %v403_v9  ;;  %v390_v9 = vrot.slane %v296_v3, 6  ;;  %v276_v10 = vmul.f32 %v271_v4, %v267_v8 }
  0xda   : > { %v1294_v17 = vmul.f32 %v584_v12, %v1289_v15  ;;  %v396_v5 = vrot.slane %v316_v11, 4 }
  0xdb   : > { %v419_v62 = vsel %vm418_vm5, %v276_v10, %v390_v9 }
  0xdc   : > { %v421_v51 = vsel %vm216_vm0, %v419_v62, %v396_v5 }
  0xe0   : > { %v1310_v31 = vpop.permute.xlu1 %519 }
  0xe4   : > { %v331_v38 = vpop.permute.xlu1 %330 }
  0xe5   : > { %v333_v39 = vsel %vm332_vm9, %v1243_v48, %v331_v38  ;;  %v337_v40 = vsel %vm332_vm9, %v331_v38, %v1243_v48 }
  0xe6   : > { %v346_v45 = vmul.f32 %v341_v34, %v333_v39  ;;  %v347_v46 = vmul.f32 %v345_v35, %v337_v40  ;;  %v1410_v34 = vrot.slane %v1279_v6, %v1262_v57  ;;  %v505_v35 = vrot.slane %v1318_v41, %v1245_v49 }
  0xe7   : > { %v552_v57 = vrot.slane %v1318_v41, %v1253_v53 }
  0xe8   : > { %v426_v56 = vsel %vm418_vm5, %v346_v45, %v408_v42  ;;  %v427_v58 = vsel %vm418_vm5, %v347_v46, %v409_v44  ;;  %v1386_v14 = vpop.permute.xlu1 %467  ;;  %v556_v45 = vrot.slane %v1279_v6, %v1253_v53 }
  0xe9   : > { %v428_v59 = vsel %vm216_vm0, %v426_v56, %v414_v47  ;;  %v429_v48 = vsel %vm216_vm0, %v427_v58, %v415_v54 }
  0xea   : > { %442 = vrot.lane.b32.xlu1 %v428_v59, %s1090_s15  ;;  %434 = vrot.lane.b32.xlu0 %v429_v48, %s1090_s15  ;;  %v1331_v60 = vmul.f32 %v1324_v52, %v428_v59  ;;  %v1333_v63 = vmul.f32 %v584_v12, %v429_v48  ;;  %v326_v12 = vmul.f32 %v321_v55, %v1225_v30  ;;  %v473_v30 = vpop.permute.xlu0 %472 }
  0xec   : > { %v402_v13 = vrot.slane %v326_v12, 2 }
  0xed   : > { %v567_v20 = vpop.permute.xlu1 %566 }
  0xee   : > { %491 = vrot.lane.b32.xlu1 %v428_v59, %s1091_s16  ;;  %485 = vrot.lane.b32.xlu0 %v429_v48, %s1091_s16  ;;  %v1366_v50 = vsel %vm423_vm6, %v421_v51, %v402_v13  ;;  %v1384_v61 = vpop.permute.xlu0 %515 }
  0xf1   : > { %v1390_v22 = vpop.permute.xlu1 %562 }
  0xf2   : > { %532 = vrot.lane.b32.xlu1 %v429_v48, %s1092_s21  ;;  %538 = vrot.lane.b32.xlu0 %v428_v59, %s1092_s21  ;;  %v595_v18 = vpop.permute.xlu0 %594 }
  0xf3   : > { %v599_v12 = vmul.f32 %v595_v18, %v1331_v60 }
  0xf6   : > { %611 = vrot.lane.b32.xlu1 %v429_v48, %s1093_s23  ;;  %609 = vrot.lane.b32.xlu0 %v428_v59, %s1093_s23  ;;  %v1388_v21 = vpop.permute.xlu0 %590  ;;  %v1394_v25 = vpop.permute.xlu1 %641 }
  0xfa   : > { %656 = vrot.lane.b32.xlu1 %v428_v59, %s1094_s24  ;;  %658 = vrot.lane.b32.xlu0 %v429_v48, %s1094_s24  ;;  %v1392_v24 = vpop.permute.xlu0 %637 }
  0xfb   : > { %v1398_v26 = vpop.permute.xlu1 %688 }
  0xfe   : > { %703 = vrot.lane.b32.xlu1 %v428_v59, %s1095_s29  ;;  %705 = vrot.lane.b32.xlu0 %v429_v48, %s1095_s29 }
  0xff   : > { %v1402_v28 = vpop.permute.xlu1 %684 }
 0x102   : > { %483 = vrot.lane.b32.xlu0 %v1289_v15, %s1091_s16  ;;  %432 = vrot.lane.b32.xlu1 %v1289_v15, %s1090_s15 }
 0x106   : > { %530 = vrot.lane.b32.xlu0 %v1289_v15, %s1092_s21  ;;  %440 = vrot.lane.b32.xlu1 %v1366_v50, %s1090_s15  ;;  %s1012_s15 = scalar_lea.vmem %s1011_s14, 256 }
 0x107   : > { %p1014_p3 = scmp.lt.s32.totalorder %s1012_s15, %s1006_s13 }
 0x109   : > { %p1015_p4 = por %p1014_p3, %p1013_p2 }
 0x10a   : > { %654 = vrot.lane.b32.xlu0 %v1289_v15, %s1094_s24  ;;  %489 = vrot.lane.b32.xlu1 %v1366_v50, %s1091_s16 }
 0x10b   : > { %p1016_p7 = pnand %p1015_p4, %p1009_p12 }
 0x10e   : > { %701 = vrot.lane.b32.xlu0 %v1289_v15, %s1095_s29  ;;  %536 = vrot.lane.b32.xlu1 %v1366_v50, %s1092_s21 }
 0x112   : > { %605 = vrot.lane.b32.xlu1 %v1366_v50, %s1093_s23 }
 0x116   : > { %607 = vrot.lane.b32.xlu1 %v1289_v15, %s1093_s23  ;;  %v1396_v15 = vpop.permute.xlu0 %735 }
 0x11a   : > { %652 = vrot.lane.b32.xlu1 %v1366_v50, %s1094_s24  ;;  %v1400_v27 = vpop.permute.xlu0 %731 }
 0x11e   : > { %699 = vrot.lane.b32.xlu1 %v1366_v50, %s1095_s29 }
 0x15c   : > { %v443_v29 = vpop.permute.xlu1 %442  ;;  %v435_v32 = vpop.permute.xlu0 %434 }
 0x15d   : > { %v446_v37 = vsel %vm444_vm10, %v443_v29, %v435_v32  ;;  %v452_v38 = vsel %vm444_vm10, %v435_v32, %v443_v29 }
 0x15e   : > { %v463_v46 = vmul.f32 %v1406_v33, %v452_v38  ;;  %v464_v49 = vmul.f32 %v1410_v34, %v446_v37 }
 0x160   : > { %v492_v39 = vpop.permute.xlu1 %491  ;;  %v486_v40 = vpop.permute.xlu0 %485  ;;  %v477_v3 = vmul.f32 %v473_v30, %v463_v46  ;;  %v478_v4 = vmul.f32 %v473_v30, %v464_v49 }
 0x161   : > { %v495_v42 = vsel %vm493_vm11, %v492_v39, %v486_v40  ;;  %v501_v44 = vsel %vm493_vm11, %v486_v40, %v492_v39 }
 0x162   : > { %v512_v47 = vmul.f32 %v505_v35, %v501_v44  ;;  %v513_v54 = vmul.f32 %v509_v36, %v495_v42 }
 0x164   : > { %v524_v56 = vmul.f32 %v1310_v31, %v512_v47  ;;  %v525_v58 = vmul.f32 %v1310_v31, %v513_v54  ;;  %v533_v59 = vpop.permute.xlu1 %532  ;;  %v539_v48 = vpop.permute.xlu0 %538  ;;  %v600_v31 = vmul.f32 %v595_v18, %v1333_v63  ;;  %v585_v63 = vmul.f32 %v1324_v52, %v1366_v50 }
 0x165   : > { %v542_v0 = vsel %vm540_vm12, %v539_v48, %v533_v59  ;;  %v548_v1 = vsel %vm540_vm12, %v533_v59, %v539_v48 }
 0x166   : > { %v559_v7 = vmul.f32 %v552_v57, %v548_v1  ;;  %v560_v53 = vmul.f32 %v556_v45, %v542_v0  ;;  %v528_v8 = vadd.f32 %v524_v56, %v477_v3  ;;  %v529_v43 = vadd.f32 %v525_v58, %v478_v4 }
 0x167   : > { %v627_v56 = vrot.slane %v1318_v41, %v1304_v23  ;;  %v631_v58 = vrot.slane %v1279_v6, %v1304_v23  ;;  %v678_v23 = vrot.slane %v1279_v6, %v1291_v16 }
 0x168   : > { %v571_v55 = vmul.f32 %v567_v20, %v559_v7  ;;  %v572_v9 = vmul.f32 %v567_v20, %v560_v53  ;;  %v612_v10 = vpop.permute.xlu1 %611  ;;  %v610_v11 = vpop.permute.xlu0 %609  ;;  %v674_v53 = vrot.slane %v1318_v41, %v1291_v16 }
 0x169   : > { %v615_v52 = vsel %vm613_vm13, %v610_v11, %v612_v10  ;;  %v623_v50 = vsel %vm613_vm13, %v612_v10, %v610_v11 }
 0x16a   : > { %v575_v62 = vadd.f32 %v571_v55, %v528_v8  ;;  %v576_v5 = vadd.f32 %v572_v9, %v529_v43  ;;  %v635_v43 = vmul.f32 %v631_v58, %v623_v50 }
 0x16c   : > { %v1432_v13 = vadd.f32 %v599_v12, %v575_v62  ;;  %v1434_v51 = vadd.f32 %v600_v31, %v576_v5  ;;  %v657_v29 = vpop.permute.xlu1 %656  ;;  %v659_v30 = vpop.permute.xlu0 %658 }
 0x16d   : > { %v662_v8 = vsel %vm660_vm14, %v657_v29, %v659_v30 }
 0x16e   : > { %v681_v11 = vmul.f32 %v674_v53, %v662_v8 }
 0x170   : > { %v704_v32 = vpop.permute.xlu1 %703  ;;  %v706_v37 = vpop.permute.xlu0 %705 }
 0x171   : > { %v709_v55 = vsel %vm707_vm15, %v704_v32, %v706_v37  ;;  %v717_v16 = vsel %vm707_vm15, %v706_v37, %v704_v32 }
 0x174   : > { %v433_v38 = vpop.permute.xlu1 %432  ;;  %v484_v40 = vpop.permute.xlu0 %483 }
 0x178   : > { %v441_v39 = vpop.permute.xlu1 %440  ;;  %v531_v18 = vpop.permute.xlu0 %530 }
 0x179   : > { %v445_v46 = vsel %vm444_vm10, %v441_v39, %v433_v38  ;;  %v451_v49 = vsel %vm444_vm10, %v433_v38, %v441_v39 }
 0x17a   : > { %v461_v0 = vmul.f32 %v1406_v33, %v451_v49  ;;  %v462_v1 = vmul.f32 %v1410_v34, %v445_v46  ;;  %v670_v33 = vsel %vm660_vm14, %v659_v30, %v657_v29 }
 0x17b   : > { %v682_v12 = vmul.f32 %v678_v23, %v670_v33 }
 0x17c   : > { %v490_v20 = vpop.permute.xlu1 %489  ;;  %v475_v9 = vmul.f32 %v1386_v14, %v461_v0  ;;  %v655_v62 = vpop.permute.xlu0 %654 }
 0x17d   : > { %v494_v42 = vsel %vm493_vm11, %v490_v20, %v484_v40  ;;  %v500_v60 = vsel %vm493_vm11, %v484_v40, %v490_v20  ;;  %v598_v40 = vmul.f32 %v1388_v21, %v1294_v17 }
 0x17e   : > { %v510_v59 = vmul.f32 %v505_v35, %v500_v60  ;;  %v511_v48 = vmul.f32 %v509_v36, %v494_v42  ;;  %v721_v35 = vrot.slane %v1318_v41, %v1298_v19  ;;  %v725_v36 = vrot.slane %v1279_v6, %v1298_v19 }
 0x17f   : > { %v476_v41 = vmul.f32 %v1386_v14, %v462_v1  ;;  %v647_v14 = vmul.f32 %v1394_v25, %v635_v43 }
 0x180   : > { %v537_v44 = vpop.permute.xlu1 %536  ;;  %v522_v34 = vmul.f32 %v1384_v61, %v510_v59  ;;  %v728_v38 = vmul.f32 %v721_v35, %v709_v55  ;;  %v729_v39 = vmul.f32 %v725_v36, %v717_v16  ;;  %v702_v59 = vpop.permute.xlu0 %701 }
 0x181   : > { %v541_v47 = vsel %vm540_vm12, %v537_v44, %v531_v18  ;;  %v547_v54 = vsel %vm540_vm12, %v531_v18, %v537_v44  ;;  %v693_v18 = vmul.f32 %v1398_v26, %v681_v11  ;;  %v694_v44 = vmul.f32 %v1398_v26, %v682_v12 }
 0x182   : > { %v557_v3 = vmul.f32 %v552_v57, %v547_v54  ;;  %v558_v4 = vmul.f32 %v556_v45, %v541_v47  ;;  %v523_v57 = vmul.f32 %v1384_v61, %v511_v48  ;;  %v634_v45 = vmul.f32 %v627_v56, %v615_v52 }
 0x183   : > { %v526_v5 = vadd.f32 %v522_v34, %v475_v9  ;;  %v651_v17 = vadd.f32 %v647_v14, %v1434_v51 }
 0x184   : > { %v606_v7 = vpop.permute.xlu1 %605  ;;  %v569_v6 = vmul.f32 %v1390_v22, %v557_v3  ;;  %v570_v19 = vmul.f32 %v1390_v22, %v558_v4  ;;  %v527_v29 = vadd.f32 %v523_v57, %v476_v41  ;;  %v646_v37 = vmul.f32 %v1394_v25, %v634_v45 }
 0x185   : > { %v597_v22 = vmul.f32 %v1388_v21, %v585_v63  ;;  %v740_v21 = vmul.f32 %v1396_v15, %v728_v38 }
 0x186   : > { %v573_v20 = vadd.f32 %v569_v6, %v526_v5  ;;  %v574_v42 = vadd.f32 %v570_v19, %v527_v29 }
 0x188   : > { %v608_v10 = vpop.permute.xlu1 %607  ;;  %v601_v26 = vadd.f32 %v597_v22, %v573_v20  ;;  %v602_v48 = vadd.f32 %v598_v40, %v574_v42 }
 0x189   : > { %v614_v31 = vsel %vm613_vm13, %v606_v7, %v608_v10  ;;  %v622_v61 = vsel %vm613_vm13, %v608_v10, %v606_v7 }
 0x18a   : > { %v632_v30 = vmul.f32 %v627_v56, %v614_v31  ;;  %v633_v32 = vmul.f32 %v631_v58, %v622_v61  ;;  %v650_v56 = vadd.f32 %v646_v37, %v1432_v13  ;;  %v741_v58 = vmul.f32 %v1396_v15, %v729_v39 }
 0x18c   : > { %v653_v60 = vpop.permute.xlu1 %652  ;;  %v644_v25 = vmul.f32 %v1392_v24, %v632_v30  ;;  %v645_v47 = vmul.f32 %v1392_v24, %v633_v32  ;;  %v697_v1 = vadd.f32 %v693_v18, %v650_v56  ;;  %v698_v24 = vadd.f32 %v694_v44, %v651_v17 }
 0x18d   : > { %v661_v46 = vsel %vm660_vm14, %v653_v60, %v655_v62  ;;  %v669_v49 = vsel %vm660_vm14, %v655_v62, %v653_v60 }
 0x18e   : > { %v679_v54 = vmul.f32 %v674_v53, %v661_v46  ;;  %v680_v63 = vmul.f32 %v678_v23, %v669_v49  ;;  %v648_v4 = vadd.f32 %v644_v25, %v601_v26  ;;  %v649_v51 = vadd.f32 %v645_v47, %v602_v48 }
 0x18f   : > { %v744_v23 = vadd.f32 %v740_v21, %v697_v1  ;;  %v745_v15 = vadd.f32 %v741_v58, %v698_v24 }
 0x190   : > { %v691_v52 = vmul.f32 %v1402_v28, %v679_v54  ;;  %v692_v50 = vmul.f32 %v1402_v28, %v680_v63  ;;  %v700_v0 = vpop.permute.xlu1 %699 }
 0x191   : > { %v708_v3 = vsel %vm707_vm15, %v700_v0, %v702_v59  ;;  %v716_v13 = vsel %vm707_vm15, %v702_v59, %v700_v0  ;;  %v746_v43 = vsel %vm423_vm6, %v744_v23, 0.0  ;;  %v754_v55 = vsel %vm423_vm6, %v745_v15, 0.0 }
 0x192   : > { %v726_v7 = vmul.f32 %v721_v35, %v708_v3  ;;  %v727_v53 = vmul.f32 %v725_v36, %v716_v13  ;;  %v695_v8 = vadd.f32 %v691_v52, %v648_v4  ;;  %v696_v33 = vadd.f32 %v692_v50, %v649_v51 }
 0x194   : > { %v738_v34 = vmul.f32 %v1400_v27, %v726_v7  ;;  %v739_v57 = vmul.f32 %v1400_v27, %v727_v53  ;;  %v763_v27 = vstv %s762_s30 }
 0x196   : > { %v742_v28 = vadd.f32 %v738_v34, %v695_v8  ;;  %v743_v45 = vadd.f32 %v739_v57, %v696_v33 }
 0x198   : > { %v747_v16 = vadd.f32 %v746_v43, %v742_v28  ;;  %v755_v9 = vadd.f32 %v754_v55, %v743_v45 }
 0x19a   : > { %v748_v41 = vrot.slane %v747_v16, 4  ;;  %v756_v6 = vrot.slane %v755_v9, 4 }
 0x19c   : > { %v749_v35 = vadd.f32 %v748_v41, %v747_v16  ;;  %v757_v36 = vadd.f32 %v756_v6, %v755_v9 }
 0x19e   : > { %v750_v19 = vrot.slane %v749_v35, 2  ;;  %v758_v10 = vrot.slane %v757_v36, 2 }
 0x1a0   : > { %v751_v11 = vadd.f32 %v750_v19, %v749_v35  ;;  %v759_v12 = vadd.f32 %v758_v10, %v757_v36 }
 0x1a2   : > { %v752_v31 = vrot.slane %v751_v11, 1  ;;  %v760_v61 = vrot.slane %v759_v12, 1 }
 0x1a4   : > { %v753_v62 = vadd.f32 %v752_v31, %v751_v11  ;;  %v761_v5 = vadd.f32 %v760_v61, %v759_v12 }
 0x1a6   : > { %v764_v29 = vadd.f32 %v763_v27, %v753_v62  ;;  %v765_v30 = vadd.f32 %v763_v27, %v761_v5 }
 0x1a8   : > { %v879_v32 = vmul.f32 -1.442695, %v764_v29  ;;  %v880_v37 = vmul.f32 -1.442695, %v765_v30 }
 0x1aa   : > { %970 = vpow2.f32 %v879_v32 }
 0x1ab   : > { %972 = vpow2.f32 %v880_v37 }
 0x1b4   : > { %v971_v14 = vpop.eup %970 }
 0x1b5   : > { %v973_v38 = vpop.eup %972  ;;  %v772_v39 = vadd.f32 1.0, %v971_v14 }
 0x1b6   : > { %v773_v22 = vadd.f32 1.0, %v973_v38 }
 0x1b7   : > { %974 = vrcp.f32 %v772_v39 }
 0x1b8   : > { %976 = vrcp.f32 %v773_v22 }
 0x1c1   : > { %v975_v40 = vpop.eup %974 }
 0x1c2   : > { %v977_v20 = vpop.eup %976 }
 0x1c3   : > { %v780_v42 = vcombine.low %v975_v40, %v977_v20 }
 0x1c5   : > { %v782_v60 = vmul.f32 %v780_v42, %v1214_v2 }
 0x1c7   : > { %783 = vst [vmem:[%s206_s7] sm:$0xff] %v782_v60 }
 0x1c8   : > { %1019 = shalt.err (!%p1016_p7)
}
 0x1c9   : > { %s1020_s16 = scalar_lea.hbm %s1501_s11, 128  ;;  %s1024_s24 = scalar_lea.hbm %s1547_s4, 256 }
 0x1ca   : > { %p1021_p8 = scmp.ne.s32.totalorder %s1501_s11, %s1020_s16  ;;  %p1025_p1 = scmp.lt.u32.totalorder %s1501_s11, %s1547_s4 }
 0x1cb   : > { %p1026_p0 = scmp.lt.u32.totalorder %s1024_s24, %s1020_s16  ;;  %p1028_p6 = scmp.lt.u32.totalorder %s1020_s16, %s1501_s11 }
 0x1cc   : > { %p1022_p11 = pnand %p1021_p8, %p1558_p9 }
 0x1cd   : > { %p1027_p5 = por %p1026_p0, %p1025_p1 }
 0x1ce   : > { %p1023_p13 = pneg %p1022_p11 }
 0x1cf   : > { %p1029_p10 = por %p1028_p6, %p1027_p5 }
 0x1d1   : > { %p1030_p12 = pnand %p1029_p10, %p1023_p13 }
 0x1d3   : > { %1033 = shalt.err (!%p1030_p12)
}
 0x1d4   : > { %892 = dma.vmem_to_hbm [thread:$0]  (%p1558_p9), %s1503_s8, 128, %s1501_s11, %s785_s12  }
 0x1d5 PF: > { %p904_p2 = scmp.ge.s32.totalorder %s1072_s20, 2  ;;  %s811_s28 = sand.u32 1, %s1060_s17  }
 0x1d6   : > { %p1559_p3 = scmp.ne.s32.totalorder %s1552_s27, 0  ;;  %s812_s5 = scalar_lea.sflag [#allocation5], %s811_s28 }
 0x1d8   : > { %p899_p4 = pnand %p904_p2, %p1559_p3 }
 0x1da   : > { %1055 = dma.done.wait (!%p899_p4), %s812_s5, 128  }
 0x1db   : > { %1057 = vsyncadd (!%p899_p4), %s812_s5, 4294967168  ;;  %p16_p7 = scmp.ge.s32.totalorder %s1150_s22, 4   ;;  %s1560_s17 = smov %s1064_s18 }
 0x1dc   : > { %s1561_s18 = smov %s1068_s19  ;;  %s1562_s19 = smov %s1161_s25 }
 0x1dd   : > { %s1563_s20 = smov %s1150_s22  ;;  %18 = sbr.rel (!%p16_p7) target bundleno = 6 (0x6), region = 76 }
 0x1e4   :  { %817 = vsyncpa [#allocation4], 1 }
 0x1e5   :  { %819 = vsyncpa [#allocation4 + $0x1], 1 }
 0x1e6   :  { %820 = vsyncpa [#allocation5], 1 }
 0x1e7   :  { %822 = vsyncpa [#allocation5 + $0x1], 1 }

</bundles_post_ra>
